<compile_context>
chip_gen: v7x
topology: tpu7x:2x2x1
jax: 0.10.0
libtpu: 0.0.40
codegen_flags: <defaults>
</compile_context>

<pallas_src>
import jax
import jax.numpy as jnp
import numpy as np
from jax.experimental import pallas as pl
from jax.experimental.pallas import tpu as pltpu


def _fused_conv_kernel(xe_ref, xo_ref, w_ref, b_ref, o_ref):
    # xe_ref: (tb, He, D)  bf16  even time-phase rows  x_pad[2t]
    # xo_ref: (tb, Ho, D)  bf16  odd  time-phase rows  x_pad[2t+1]
    # w_ref : (K, D, D)    bf16  fused depthwise+pointwise weight, one per tap
    # b_ref : (1, D)       f32   fused bias
    # o_ref : (tb, H_out, D)
    tb, h_out, d = o_ref.shape
    n_taps = w_ref.shape[0]
    bias = b_ref[...]                                   # (1, D) f32
    for j in range(tb):                                 # unrolled at trace time
        xe = xe_ref[j]                                  # (He, D) bf16
        xo = xo_ref[j]                                  # (Ho, D) bf16
        acc = jnp.zeros((h_out, d), jnp.float32)
        for k in range(n_taps):
            # stride-2 conv tap k reads x_pad[2h + k]:
            #   k even -> even phase slab at row offset k//2
            #   k odd  -> odd  phase slab at row offset k//2
            src = xe if k % 2 == 0 else xo
            off = k // 2
            tap = src[off:off + h_out, :]               # contiguous slice
            acc = acc + jnp.dot(tap, w_ref[k],
                                preferred_element_type=jnp.float32)
        # TODO(synk): if production D < 128, pack rows onto lanes for a
        # lane-dense store; with encoder_dim=256 this is moot.
        o_ref[j] = (acc + bias).astype(o_ref.dtype)


def time_reduction_layer_2d(xs, xs_lens, mask, mask_pad, params,
                            kernel_size=5, stride=2, out_dtype=None):
    if stride != 2:
        raise NotImplementedError("even/odd phase-split path assumes stride=2")
    dw_w, dw_b, pw_w, pw_b = (params["dw_w"], params["dw_b"],
                              params["pw_w"], params["pw_b"])
    B, T, D = xs.shape
    out_dtype = xs.dtype if out_dtype is None else jnp.dtype(out_dtype)

    padding1 = kernel_size - stride
    t_pad = T + padding1
    # Conv2dValid's validx/validy are both 0 for these hyper-params, so the
    # conv output length is the plain VALID formula.
    h_out = (t_pad - kernel_size) // stride + 1
    assert h_out >= 1

    # ---- wrapper-side prep (all fused by XLA; ~1x traffic on xs) ------------
    # mask once, zero-pad the time axis, cast to bf16, split into even/odd
    # time phases so every conv tap becomes a contiguous slice in the kernel.
    x = xs * mask_pad[:, 0, :, None].astype(xs.dtype)
    x = jnp.pad(x, ((0, 0), (0, padding1), (0, 0))).astype(jnp.bfloat16)
    x_even = x[:, 0::2, :]                               # (B, He, D)
    x_odd = x[:, 1::2, :]                                # (B, Ho, D)
    he, ho = x_even.shape[1], x_odd.shape[1]
    assert he >= h_out + (kernel_size - 1) // 2
    assert ho >= h_out + (kernel_size - 2) // 2

    # fuse the 1x1 pointwise conv into the per-tap weights (one-time cost).
    wdw = jnp.transpose(dw_w[:, :, :, 0], (2, 1, 0))     # (K, c_in, c_mid)
    wpw = jnp.transpose(pw_w[:, :, 0, 0], (1, 0))        # (c_mid, c_out)
    w_comb = jnp.einsum('kim,mo->kio', wdw, wpw).astype(jnp.bfloat16)  # (K,D,D)
    b_comb = (dw_b @ wpw + pw_b)[None, :].astype(jnp.float32)          # (1,D)

    # ---- tiling: batches per grid step -------------------------------------
    rows_target = 512
    tb = max(1, min(B, rows_target // max(h_out, 1)))
    # tb must divide B; keep >= 2 grid steps when B >= 2 (v7x has 2 TCs).
    while tb > 1 and (B % tb != 0 or B // tb < 2):
        tb -= 1
    grid = (B // tb,)
    # TODO(synk): for very long sequences (h_out*D*bf16 approaching the VMEM
    # budget) the time axis would need halo-aware tiling as well.

    # ---- VMEM budget / cost hints -------------------------------------------
    out_itemsize = jnp.dtype(out_dtype).itemsize
    footprint = (2 * tb * (he + ho) * D * 2                     # dbl-buffered bf16 inputs
                 + 2 * (kernel_size * D * D * 2 + D * 4)        # weights + bias
                 + 2 * tb * h_out * D * out_itemsize)           # dbl-buffered output
    try:
        phys_vmem = int(getattr(pltpu.get_tpu_info(), "vmem_capacity_bytes",
                                64 * 1024 * 1024))
    except Exception:
        phys_vmem = 64 * 1024 * 1024
    # generation-aware scoped-VMEM cap: v7x-class parts only have 64 MiB.
    vmem_cap = (48 * 1024 * 1024 if phys_vmem <= 64 * 1024 * 1024
                else 64 * 1024 * 1024)
    vmem_limit = int(min(vmem_cap, max(8 * 1024 * 1024, 4 * footprint)))

    flops = 2 * B * h_out * kernel_size * D * D + B * h_out * D
    bytes_accessed = (x_even.size * 2 + x_odd.size * 2
                      + w_comb.size * 2 + b_comb.size * 4
                      + B * h_out * D * out_itemsize)

    # TODO(synk): on v7x, pipeline_mode=pl.Buffered(1) on the constant weight/
    # bias streams would free a little VMEM headroom; skipped for portability.
    out = pl.pallas_call(
        _fused_conv_kernel,
        out_shape=jax.ShapeDtypeStruct((B, h_out, D), out_dtype),
        grid_spec=pltpu.PrefetchScalarGridSpec(
            num_scalar_prefetch=0,
            grid=grid,
            in_specs=[
                pl.BlockSpec((tb, he, D), lambda i: (i, 0, 0)),
                pl.BlockSpec((tb, ho, D), lambda i: (i, 0, 0)),
                pl.BlockSpec((kernel_size, D, D), lambda i: (0, 0, 0)),
                pl.BlockSpec((1, D), lambda i: (0, 0)),
            ],
            out_specs=pl.BlockSpec((tb, h_out, D), lambda i: (i, 0, 0)),
        ),
        compiler_params=pltpu.CompilerParams(
            dimension_semantics=("parallel",),
            vmem_limit_bytes=vmem_limit),
        cost_estimate=pl.CostEstimate(
            flops=flops, transcendentals=0, bytes_accessed=bytes_accessed),
    )(x_even, x_odd, w_comb, b_comb)

    # ---- tail glue (matches the PyTorch module) ------------------------------
    new_lens = (xs_lens + 1) // 2            # trunc == floor for non-negative
    # TODO(synk): PyTorch uses dynamic padding2 = max(new_lens) - h_out; the
    # static bound (T+1)//2 - h_out keeps the wrapper jit-compatible and is
    # consistent with new_mask / new_mask_pad below (extra rows are zeros).
    padding2 = max(0, (T + 1) // 2 - h_out)
    if padding2 > 0:
        out = jnp.concatenate(
            [out, jnp.zeros((B, padding2, D), dtype=out.dtype)], axis=1)
    new_mask = mask[:, ::2, ::2]
    new_mask_pad = mask_pad[:, :, ::2]
    return out, new_lens, new_mask, new_mask_pad


def _reference(xs, mask_pad, dw_w, dw_b, pw_w, pw_b, kernel_size, stride):
    """Pure-jnp reference of the conv hot path (pre padding2-concat)."""
    B, T, D = xs.shape
    x = xs * mask_pad[:, 0, :, None].astype(xs.dtype)
    p1 = kernel_size - stride
    x = jnp.pad(x, ((0, 0), (0, p1), (0, 0)))
    h_out = (T + p1 - kernel_size) // stride + 1
    out1 = jnp.zeros((B, h_out, D), jnp.float32)
    for k in range(kernel_size):
        win = x[:, k:k + stride * (h_out - 1) + 1:stride, :]
        out1 = out1 + jnp.einsum('bhd,od->bho', win, dw_w[:, :, k, 0])
    out1 = out1 + dw_b
    return jnp.einsum('bhd,od->bho', out1, pw_w[:, :, 0, 0]) + pw_b


if __name__ == "__main__":
    kernel_size, stride = 5, 2
    B, T, D = 2, 16, 32   # batch, seq, encoder_dim

    key = jax.random.PRNGKey(0)
    k_dw_w, k_dw_b, k_pw_w, k_pw_b, k_x = jax.random.split(key, 5)

    dw_max = kernel_size ** (-0.5)
    pw_max = D ** (-0.5)
    params = {
        "dw_w": jax.random.uniform(k_dw_w, (D, D, kernel_size, 1),
                                   jnp.float32, -dw_max, dw_max),
        "dw_b": jax.random.uniform(k_dw_b, (D,), jnp.float32, -dw_max, dw_max),
        "pw_w": jax.random.uniform(k_pw_w, (D, D, 1, 1),
                                   jnp.float32, -pw_max, pw_max),
        "pw_b": jax.random.uniform(k_pw_b, (D,), jnp.float32, -pw_max, pw_max),
    }

    xs = jax.random.normal(k_x, (B, T, D), jnp.float32)
    xs_lens = jnp.array([16, 11], dtype=jnp.int32)
    t_idx = jnp.arange(T)
    mask_pad = (t_idx[None, None, :] < xs_lens[:, None, None])      # (B,1,T)
    mask = (t_idx[None, :, None] < xs_lens[:, None, None]) & \
           (t_idx[None, None, :] < xs_lens[:, None, None])          # (B,T,T)

    out, new_lens, new_mask, new_mask_pad = time_reduction_layer_2d(
        xs, xs_lens, mask, mask_pad, params,
        kernel_size=kernel_size, stride=stride)
    out = jax.block_until_ready(out)

    # sanity check against a plain-JAX reference of the conv path
    ref = _reference(xs, mask_pad, params["dw_w"], params["dw_b"],
                     params["pw_w"], params["pw_b"], kernel_size, stride)
    np.testing.assert_allclose(np.asarray(out[:, :ref.shape[1], :]),
                               np.asarray(ref), rtol=2e-2, atol=2e-2)
    assert out.shape[0] == B and out.shape[2] == D
    assert new_lens.shape == (B,)
    assert new_mask.shape == (B, (T + 1) // 2, (T + 1) // 2)
    assert new_mask_pad.shape == (B, 1, (T + 1) // 2)

    print("KERNEL_OK")
</pallas_src>

<mosaic_0001>
module attributes {stable_mosaic.version = 11 : i64} {
  func.func @_fused_conv_kernel(%arg0: i32, %arg1: memref<1x10x32xbf16, #tpu.memory_space<vmem>>, %arg2: memref<1x9x32xbf16, #tpu.memory_space<vmem>>, %arg3: memref<5x32x32xbf16, #tpu.memory_space<vmem>>, %arg4: memref<1x32xf32, #tpu.memory_space<vmem>>, %arg5: memref<1x8x32xf32, #tpu.memory_space<vmem>>) attributes {dimension_semantics = [#tpu.dimension_semantics<parallel>], iteration_bounds = array<i64: 2>, scalar_prefetch = 0 : i64, scratch_operands = 0 : i64, tpu.core_type = #tpu.core_type<tc>, window_params = [{transform_indices = @transform_0, window_bounds = array<i64: 1, 10, 32>}, {transform_indices = @transform_1, window_bounds = array<i64: 1, 9, 32>}, {pipeline_mode = #tpu.pipeline_mode<synchronous>, transform_indices = @transform_2, window_bounds = array<i64: 5, 32, 32>}, {pipeline_mode = #tpu.pipeline_mode<synchronous>, transform_indices = @transform_3, window_bounds = array<i64: 1, 32>}, {transform_indices = @transform_4, window_bounds = array<i64: 1, 8, 32>}]} {
    %c0 = arith.constant 0 : index
    %c0_0 = arith.constant 0 : index
    %0 = vector.load %arg4[%c0, %c0_0] : memref<1x32xf32, #tpu.memory_space<vmem>>, vector<1x32xf32>
    %c0_1 = arith.constant 0 : index
    %c0_2 = arith.constant 0 : index
    %c0_3 = arith.constant 0 : index
    %1 = vector.load %arg1[%c0_1, %c0_2, %c0_3] : memref<1x10x32xbf16, #tpu.memory_space<vmem>>, vector<1x10x32xbf16>
    %2 = vector.shape_cast %1 : vector<1x10x32xbf16> to vector<10x32xbf16>
    %c0_4 = arith.constant 0 : index
    %c0_5 = arith.constant 0 : index
    %c0_6 = arith.constant 0 : index
    %3 = vector.load %arg2[%c0_4, %c0_5, %c0_6] : memref<1x9x32xbf16, #tpu.memory_space<vmem>>, vector<1x9x32xbf16>
    %4 = vector.shape_cast %3 : vector<1x9x32xbf16> to vector<9x32xbf16>
    %cst = arith.constant 0.000000e+00 : f32
    %5 = vector.broadcast %cst : f32 to vector<8x32xf32>
    %6 = vector.extract_strided_slice %2 {offsets = [0, 0], sizes = [8, 32], strides = [1, 1]} : vector<10x32xbf16> to vector<8x32xbf16>
    %c0_7 = arith.constant 0 : index
    %c0_8 = arith.constant 0 : index
    %c0_9 = arith.constant 0 : index
    %7 = vector.load %arg3[%c0_7, %c0_8, %c0_9] : memref<5x32x32xbf16, #tpu.memory_space<vmem>>, vector<1x32x32xbf16>
    %8 = vector.shape_cast %7 : vector<1x32x32xbf16> to vector<32x32xbf16>
    %cst_10 = arith.constant dense<0.000000e+00> : vector<8x32xf32>
    %9 = tpu.matmul %6, %8, %cst_10 {dimension_numbers = #tpu.dot_dimension_numbers<[1], [0], [0], [1], [0, 0, 1, 1], [], []>} : vector<8x32xbf16>, vector<32x32xbf16>, vector<8x32xf32> -> vector<8x32xf32>
    %10 = arith.addf %5, %9 : vector<8x32xf32>
    %11 = vector.extract_strided_slice %4 {offsets = [0, 0], sizes = [8, 32], strides = [1, 1]} : vector<9x32xbf16> to vector<8x32xbf16>
    %c1 = arith.constant 1 : index
    %c0_11 = arith.constant 0 : index
    %c0_12 = arith.constant 0 : index
    %12 = vector.load %arg3[%c1, %c0_11, %c0_12] : memref<5x32x32xbf16, #tpu.memory_space<vmem>>, vector<1x32x32xbf16>
    %13 = vector.shape_cast %12 : vector<1x32x32xbf16> to vector<32x32xbf16>
    %cst_13 = arith.constant dense<0.000000e+00> : vector<8x32xf32>
    %14 = tpu.matmul %11, %13, %cst_13 {dimension_numbers = #tpu.dot_dimension_numbers<[1], [0], [0], [1], [0, 0, 1, 1], [], []>} : vector<8x32xbf16>, vector<32x32xbf16>, vector<8x32xf32> -> vector<8x32xf32>
    %15 = arith.addf %10, %14 : vector<8x32xf32>
    %16 = vector.extract_strided_slice %2 {offsets = [1, 0], sizes = [8, 32], strides = [1, 1]} : vector<10x32xbf16> to vector<8x32xbf16>
    %c2 = arith.constant 2 : index
    %c0_14 = arith.constant 0 : index
    %c0_15 = arith.constant 0 : index
    %17 = vector.load %arg3[%c2, %c0_14, %c0_15] : memref<5x32x32xbf16, #tpu.memory_space<vmem>>, vector<1x32x32xbf16>
    %18 = vector.shape_cast %17 : vector<1x32x32xbf16> to vector<32x32xbf16>
    %cst_16 = arith.constant dense<0.000000e+00> : vector<8x32xf32>
    %19 = tpu.matmul %16, %18, %cst_16 {dimension_numbers = #tpu.dot_dimension_numbers<[1], [0], [0], [1], [0, 0, 1, 1], [], []>} : vector<8x32xbf16>, vector<32x32xbf16>, vector<8x32xf32> -> vector<8x32xf32>
    %20 = arith.addf %15, %19 : vector<8x32xf32>
    %21 = vector.extract_strided_slice %4 {offsets = [1, 0], sizes = [8, 32], strides = [1, 1]} : vector<9x32xbf16> to vector<8x32xbf16>
    %c3 = arith.constant 3 : index
    %c0_17 = arith.constant 0 : index
    %c0_18 = arith.constant 0 : index
    %22 = vector.load %arg3[%c3, %c0_17, %c0_18] : memref<5x32x32xbf16, #tpu.memory_space<vmem>>, vector<1x32x32xbf16>
    %23 = vector.shape_cast %22 : vector<1x32x32xbf16> to vector<32x32xbf16>
    %cst_19 = arith.constant dense<0.000000e+00> : vector<8x32xf32>
    %24 = tpu.matmul %21, %23, %cst_19 {dimension_numbers = #tpu.dot_dimension_numbers<[1], [0], [0], [1], [0, 0, 1, 1], [], []>} : vector<8x32xbf16>, vector<32x32xbf16>, vector<8x32xf32> -> vector<8x32xf32>
    %25 = arith.addf %20, %24 : vector<8x32xf32>
    %26 = vector.extract_strided_slice %2 {offsets = [2, 0], sizes = [8, 32], strides = [1, 1]} : vector<10x32xbf16> to vector<8x32xbf16>
    %c4 = arith.constant 4 : index
    %c0_20 = arith.constant 0 : index
    %c0_21 = arith.constant 0 : index
    %27 = vector.load %arg3[%c4, %c0_20, %c0_21] : memref<5x32x32xbf16, #tpu.memory_space<vmem>>, vector<1x32x32xbf16>
    %28 = vector.shape_cast %27 : vector<1x32x32xbf16> to vector<32x32xbf16>
    %cst_22 = arith.constant dense<0.000000e+00> : vector<8x32xf32>
    %29 = tpu.matmul %26, %28, %cst_22 {dimension_numbers = #tpu.dot_dimension_numbers<[1], [0], [0], [1], [0, 0, 1, 1], [], []>} : vector<8x32xbf16>, vector<32x32xbf16>, vector<8x32xf32> -> vector<8x32xf32>
    %30 = arith.addf %25, %29 : vector<8x32xf32>
    %31 = vector.broadcast %0 : vector<1x32xf32> to vector<8x32xf32>
    %32 = arith.addf %30, %31 : vector<8x32xf32>
    %c0_23 = arith.constant 0 : index
    %c0_24 = arith.constant 0 : index
    %c0_25 = arith.constant 0 : index
    %33 = vector.load %arg5[%c0_23, %c0_24, %c0_25] : memref<1x8x32xf32, #tpu.memory_space<vmem>>, vector<1x8x32xf32>
    %34 = vector.shape_cast %33 : vector<1x8x32xf32> to vector<8x32xf32>
    %35 = vector.shape_cast %32 : vector<8x32xf32> to vector<1x8x32xf32>
    tpu.vector_store %arg5[%c0_23, %c0_24, %c0_25], %35 {strides = array<i32>} : memref<1x8x32xf32, #tpu.memory_space<vmem>>, vector<1x8x32xf32>,
    return
  }
  func.func @transform_0(%arg0: i32) -> (i32, i32, i32) {
    %c0_i32 = arith.constant 0 : i32
    %c0_i32_0 = arith.constant 0 : i32
    %c0_i32_1 = arith.constant 0 : i32
    return %arg0, %c0_i32, %c0_i32_0 : i32, i32, i32
  }
  func.func @transform_1(%arg0: i32) -> (i32, i32, i32) {
    %c0_i32 = arith.constant 0 : i32
    %c0_i32_0 = arith.constant 0 : i32
    %c0_i32_1 = arith.constant 0 : i32
    return %arg0, %c0_i32, %c0_i32_0 : i32, i32, i32
  }
  func.func @transform_2(%arg0: i32) -> (i32, i32, i32) {
    %c0_i32 = arith.constant 0 : i32
    %c0_i32_0 = arith.constant 0 : i32
    %c0_i32_1 = arith.constant 0 : i32
    %c0_i32_2 = arith.constant 0 : i32
    return %c0_i32, %c0_i32_0, %c0_i32_1 : i32, i32, i32
  }
  func.func @transform_3(%arg0: i32) -> (i32, i32) {
    %c0_i32 = arith.constant 0 : i32
    %c0_i32_0 = arith.constant 0 : i32
    %c0_i32_1 = arith.constant 0 : i32
    return %c0_i32, %c0_i32_0 : i32, i32
  }
  func.func @transform_4(%arg0: i32) -> (i32, i32, i32) {
    %c0_i32 = arith.constant 0 : i32
    %c0_i32_0 = arith.constant 0 : i32
    %c0_i32_1 = arith.constant 0 : i32
    return %arg0, %c0_i32, %c0_i32_0 : i32, i32, i32
  }
}

</mosaic_0001>

<bundles_post_ra>
// kernel: tpu_custom_call.1
= control target key start
LH: loop header
LB: loop body
LE: loop exit
PB: predicated region body
PF: predicated region fallthrough
CT: control target
= control target key end

     0   :  { %9 = vsyncpa [#allocation3], 0  ;;  %s1105_s0 = inlined_call_operand.vmem [shape: bf16[2,10,32], index: 0, kind: input, shape index: {}]   ;;  %s1106_s1 = inlined_call_operand.vmem [shape: bf16[2,9,32], index: 1, kind: input, shape index: {}]   ;;  %s1107_s2 = inlined_call_operand.hbm [shape: bf16[5,32,32], index: 2, kind: input, shape index: {}]   ;;  %s1108_s3 = inlined_call_operand.vmem [shape: f32[1,32], index: 3, kind: input, shape index: {}]   ;;  %s1109_s4 = inlined_call_operand.hbm [shape: f32[2,8,32], index: 4, kind: output, shape index: {}]  }
   0x1   :  { %10 = vsyncpa [#allocation4], 0 }
   0x2   :  { %12 = vsyncpa [#allocation4 + $0x1], 0  ;;  %s953_s15 = smov 0   ;;  %s955_s16 = smov 0  }
   0x3   :  { %s957_s17 = smov 0   ;;  %s959_s18 = smov 0  }
   0x4 LB: > { %s974_s19 = sadd.s32 4294967295, %s920_s18   ;;  %s670_s20 = sadd.s32 4294967294, %s920_s18   ;;  %s920_s18 = sphi %s959_s18, %s1125_s18   ;;  %s916_s17 = sphi %s957_s17, %s1124_s17   ;;  %s912_s16 = sphi %s955_s16, %s1123_s16   ;;  %s908_s15 = sphi %s953_s15, %s1122_s15  }
   0x5   : > { %s978_s21 = sadd.s32 1, %s920_s18   ;;  %s119_s22 = sadd.s32 1, %s916_s17 }
   0x6   : > { %s116_s23 = ssub.s32 %s920_s18, %s978_s21  ;;  %p129_p0 = scmp.ne.s32.totalorder %s916_s17, %s912_s16 }
   0x7   : > { %p117_p1 = scmp.eq.s32.totalorder %s116_s23, 0  ;;  %p130_p2 = scmp.eq.s32.totalorder %s974_s19, 1 }
   0x8   : > { %p135_p3 = scmp.ne.s32.totalorder %s912_s16, %s908_s15  ;;  %p136_p4 = scmp.eq.s32.totalorder %s670_s20, 1 }
   0x9   : > { %s989_s24 = scalar_select %p117_p1, %s916_s17, %s119_s22  }
   0xa   : > { %p991_p5 = por %p130_p2, %p129_p0  ;;  %p995_p6 = por %p136_p4, %p135_p3 }
   0xb   : > { %p671_p7 = scmp.ge.s32.totalorder %s920_s18, 1  ;;  %p143_p8 = scmp.lt.s32.totalorder %s920_s18, 3 }
   0xc   : > { %s1113_s25 = scalar_select %p991_p5, 1, 0 }
   0xd   : > { %s1114_s26 = scalar_select %p995_p6, 1, 0 }
   0xe   : > { %p1110_p9 = scmp.eq.s32.totalorder %s974_s19, 0  ;;  %p1002_p10 = pnand %p671_p7, %p143_p8 }
   0xf   : > { %s922_s28 = smov [#allocation2]   ;;  %s826_s7 = scalar_lea.hbm %s1107_s2, 1280 }
  0x10   : > { %s1115_s27 = scalar_select %p1002_p10, 1, 0 }
  0x11   : > { %s155_s29 = sshll.u32 %s922_s28, 4  ;;  %p766_p11 = pneg %p1002_p10  ;;  %s156_s29 = int_to_ptr.vmem [resolvable:$true] %s155_s29 }
  0x12   : > { %p827_p13 = scmp.ne.s32.totalorder %s1107_s2, %s826_s7  ;;  %p833_p3 = scmp.lt.u32.totalorder %s826_s7, %s1107_s2 }
  0x13   : > { %p1010_p12 = pnand %p1110_p9, %p766_p11 }
  0x15   : > { %p828_p0 = pneg %p1010_p12 }
  0x17   : > { %p829_p1 = pnand %p828_p0, %p827_p13 }
  0x19   : > { %p830_p2 = pneg %p829_p1 }
  0x1b   : > { %p835_p4 = pnand %p833_p3, %p830_p2 }
  0x1d   : > { %838 = shalt.err (!%p835_p4)
}
  0x1e   : > { %s839_s12 = scalar_lea.vmem %s156_s29, 1280  ;;  %p847_p9 = scmp.lt.s32.totalorder %s156_s29, %s156_s29 }
  0x1f   : > { %p840_p7 = scmp.ne.s32.totalorder %s156_s29, %s839_s12  ;;  %p848_p6 = scmp.lt.s32.totalorder %s839_s12, %s839_s12 }
  0x21   : > { %p842_p8 = pnand %p840_p7, %p828_p0  ;;  %p849_p5 = por %p848_p6, %p847_p9 }
  0x23   : > { %p843_p11 = pneg %p842_p8 }
  0x25   : > { %p850_p10 = pnand %p849_p5, %p843_p11 }
  0x27   : > { %853 = shalt.err (!%p850_p10)
}
  0x28   : > { %s923_s13 = smov 64   ;;  %s924_s14 = smov 4  }
  0x29   : > { %769 = dma.hbm_to_vmem [thread:$0]  (!%p1010_p12), %s1107_s2, 1280, %s156_s29, [#allocation3], %s923_s13, %s923_s13, %s924_s14  }
  0x2a   : > { %p1117_p13 = scmp.ne.s32.totalorder %s1115_s27, 0 }
  0x2b   : > { %p1118_p1 = scmp.eq.s32.totalorder (!%p1117_p13), %s974_s19, 0 }
  0x2c   : > { %190 = sbr.rel (%p1117_p13) target bundleno = 308 (0x134), region = 36 }
  0x33   : > { %899 = dma.done.wait (%p1118_p1), [#allocation3], 1280   ;;  %p1119_p0 = pmov %p1118_p1 }
  0x34   : > { %p221_p5 = scmp.lt.s32.totalorder %s974_s19, 1  ;;  %v925_v0 = vmov 0.0   ;;  %vm926_vm0 = vmmov 0   ;;  %v814_v1 = vld [vmem:[#allocation2 + $0x10] sm:$0xff]   ;;  %v815_v2 = vld [vmem:[#allocation2] sm:$0xff]   ;;  %v816_v3 = vld [vmem:[#allocation2 + $0x18] sm:$0xff]  }
  0x35   : > { %901 = vsyncadd (%p1119_p0), [#allocation3], 4294966016  ;;  %720 = vmatprep.subr.bf16.mxu0 %v925_v0  ;;  %728 = vmatprep.subr.bf16.mxu1 %v925_v0  ;;  %v817_v4 = vld [vmem:[#allocation2 + $0x8] sm:$0xff]   ;;  %vm258_vm1 = vcmask 261120   ;;  %v820_v11 = vld [vmem:[#allocation2 + $0x20] sm:$0xff]   ;;  %s218_s8 = sand.u32 1, %s912_s16  }
  0x36   : > { %724 = vmatprep.mubr.msk.bf16.mxu0 %vm926_vm0, %v925_v0  ;;  %s222_s23 = scalar_select %p221_p5, %s974_s19, 1  ;;  %732 = vmatprep.mubr.msk.bf16.mxu1 %vm926_vm0, %v925_v0  ;;  %v821_v13 = vld [vmem:[#allocation2 + $0x30] sm:$0xff]   ;;  %v822_v17 = vld [vmem:[#allocation2 + $0x28] sm:$0xff]   ;;  %v823_v20 = vld [vmem:[#allocation2 + $0x38] sm:$0xff]  }
  0x37   : > { %721 = vmatpush3.bf16.msra.mxu0 %v814_v1  ;;  %729 = vmatpush3.bf16.msra.mxu1 %v815_v2  ;;  %v824_v23 = vld [vmem:[#allocation2 + $0x40] sm:$0xff]   ;;  %v825_v24 = vld [vmem:[#allocation2 + $0x48] sm:$0xff]   ;;  %s676_s9 = sshll.u32 %s218_s8, 3  ;;  %v698_v45 = vld [vmem:[%s1108_s3] ss:$0 sm:$0xff]  ;;  %s700_s12 = sshll.u32 %s974_s19, 7 }
  0x38   : > { %s703_s27 = sshll.u32 %s222_s23, 3  ;;  %722 = vmatprep.subr.bf16.mxu0 %v925_v0  ;;  %730 = vmatprep.subr.bf16.mxu1 %v925_v0  ;;  %s220_s13 = scalar_lea.vmem [#allocation5], %s676_s9 }
  0x39   : > { %s230_s30 = scalar_lea.vmem %s1106_s1, %s703_s27  ;;  %s225_s7 = scalar_lea.vmem %s1105_s0, %s703_s27 }
  0x3a   : > { %v235_v5 = vld [vmem:[%s230_s30] sm:$0xf]  ;;  %v236_v6 = vld [vmem:[%s230_s30 + $0x4] sm:$0x1]  ;;  %s587_s14 = sshll.u32 %s220_s13, 4  ;;  %s1062_s23 = scalar_lea.hbm %s1109_s4, %s700_s12  ;;  %s1064_s14 = int_to_ptr.vmem [resolvable:$true] %s587_s14 }
  0x3b   : > { %v233_v7 = vld [vmem:[%s225_s7] sm:$0xf]  ;;  %v691_v8 = vcombine.low %v235_v5, %v236_v6  ;;  %v234_v9 = vld [vmem:[%s225_s7 + $0x4] sm:$0x1]  ;;  %723 = vmatpush3.bf16.msra.mxu0 %v816_v3  ;;  %731 = vmatpush3.bf16.msra.mxu1 %v817_v4  ;;  %s574_s19 = scalar_lea.sflag [#allocation4], %s218_s8  ;;  %s854_s27 = scalar_lea.vmem %s1064_s14, 128 }
  0x3c   : > { %v687_v10 = vcombine.low %v233_v7, %v234_v9  ;;  %736 = vmatprep.subr.bf16.mxu0 %v925_v0  ;;  %744 = vmatprep.subr.bf16.mxu1 %v925_v0  ;;  %p855_p6 = scmp.ne.s32.totalorder %s1064_s14, %s854_s27  ;;  %p1120_p9 = scmp.ne.s32.totalorder %s1113_s25, 0 }
  0x3d   : > { %v443_v12 = vshll.u32 %v691_v8, 16  ;;  %v441_v14 = vshrl.u32 %v691_v8, 16  ;;  %s927_s28 = smov [#allocation5]  }
  0x3e   : > { %v370_v15 = vshll.u32 %v687_v10, 16  ;;  %725 = vmatmul.mubr.msk.bf16.vlgmr.msra.gmra.mrb[0].mxu0 %vm258_vm1, %v235_v5  ;;  %v368_v16 = vshrl.u32 %v687_v10, 16  ;;  %733 = vmatmul.mubr.msk.bf16.vlgmr.msra.gmra.mrb[0].mxu1 %vm258_vm1, %v233_v7  ;;  %v508_v25 = vrot.slane %v687_v10, 1  ;;  %p856_p10 = pnand %p855_p6, %p1120_p9  ;;  %s858_s29 = sshll.u32 %s927_s28, 4  ;;  %s859_s29 = int_to_ptr.vmem [resolvable:$false] %s858_s29 }
  0x3f   : > { %v445_v18 = vrot.slane %v443_v12, 1  ;;  %737 = vmatpush3.bf16.msra.mxu0 %v820_v11  ;;  %745 = vmatpush3.bf16.msra.mxu1 %v821_v13  ;;  %s860_s30 = scalar_lea.vmem %s859_s29, 256  ;;  %p861_p2 = scmp.lt.s32.totalorder %s1064_s14, %s859_s29 }
  0x40   : > { %v372_v19 = vrot.slane %v370_v15, 1  ;;  %738 = vmatprep.subr.bf16.mxu0 %v925_v0  ;;  %746 = vmatprep.subr.bf16.mxu1 %v925_v0  ;;  %p857_p12 = pneg %p856_p10  ;;  %p862_p3 = scmp.lt.s32.totalorder %s860_s30, %s854_s27 }
  0x41   : > { %740 = vmatprep.mubr.msk.bf16.mxu0 %vm926_vm0, %v925_v0  ;;  %748 = vmatprep.mubr.msk.bf16.mxu1 %vm926_vm0, %v925_v0  ;;  %v446_v22 = vor.u32 %v445_v18, %v441_v14 }
  0x42   : > { %v373_v21 = vor.u32 %v372_v19, %v368_v16  ;;  %p863_p4 = por %p862_p3, %p861_p2 }
  0x43   : > { %739 = vmatpush3.bf16.msra.mxu0 %v822_v17  ;;  %747 = vmatpush3.bf16.msra.mxu1 %v823_v20 }
  0x44   : > { %752 = vmatprep.subr.bf16.mxu0 %v925_v0  ;;  %p864_p7 = pnand %p863_p4, %p857_p12 }
  0x46   : > { %741 = vmatmul.mubr.msk.bf16.vlgmr.msra.gmra.mrb[4].mxu0 %vm258_vm1, %v373_v21  ;;  %749 = vmatmul.mubr.msk.bf16.vlgmr.msra.gmra.mrb[4].mxu1 %vm258_vm1, %v446_v22 }
  0x47   : > { %753 = vmatpush3.bf16.msra.mxu0 %v824_v23  ;;  %756 = vmatprep.mubr.msk.bf16.mxu0 %vm926_vm0, %v925_v0 }
  0x48   : > { %754 = vmatprep.subr.bf16.mxu0 %v925_v0 }
  0x4b   : > { %755 = vmatpush3.bf16.msra.mxu0 %v825_v24 }
  0x4e   : > { %757 = vmatmul.mubr.msk.bf16.vlgmr.msra.gmra.mrb[8].mxu0 %vm258_vm1, %v508_v25 }
 0x111   : > { %v296_v26 = vpop.f32.mrb[0].mxu0  ;;  %v351_v28 = vpop.f32.mrb[0].mxu1 }
 0x112   : > { %v726_v27 = vpop.f32.mrb[1].mxu0  ;;  %v352_v29 = vadd.f32 %v351_v28, %v296_v26  ;;  %v734_v31 = vpop.f32.mrb[1].mxu1 }
 0x113   : > { %v299_v30 = vpop.f32.mrb[2].mxu0  ;;  %v354_v33 = vpop.f32.mrb[2].mxu1 }
 0x114   : > { %v727_v32 = vpop.f32.mrb[3].mxu0  ;;  %v735_v34 = vpop.f32.mrb[3].mxu1 }
 0x119   : > { %v423_v35 = vpop.f32.mrb[4].mxu0  ;;  %v496_v38 = vpop.f32.mrb[4].mxu1 }
 0x11a   : > { %v429_v36 = vadd.f32 %v423_v35, %v352_v29  ;;  %v742_v37 = vpop.f32.mrb[5].mxu0  ;;  %v750_v40 = vpop.f32.mrb[5].mxu1 }
 0x11b   : > { %v426_v39 = vpop.f32.mrb[6].mxu0  ;;  %v499_v43 = vpop.f32.mrb[6].mxu1 }
 0x11c   : > { %v502_v41 = vadd.f32 %v496_v38, %v429_v36  ;;  %v743_v42 = vpop.f32.mrb[7].mxu0  ;;  %v751_v44 = vpop.f32.mrb[7].mxu1 }
 0x121   : > { %v558_v46 = vpop.f32.mrb[8].mxu0 }
 0x122   : > { %v564_v47 = vadd.f32 %v558_v46, %v502_v41  ;;  %v758_v48 = vpop.f32.mrb[9].mxu0 }
 0x123   : > { %v561_v49 = vpop.f32.mrb[10].mxu0 }
 0x124   : > { %v571_v50 = vadd.f32 %v698_v45, %v564_v47  ;;  %v759_v51 = vpop.f32.mrb[11].mxu0 }
 0x126   : > { %572 = vst.msk [vmem:[%s220_s13] sm:$0xff] %vm258_vm1, %v571_v50 }
 0x127   : > { %867 = shalt.err (!%p864_p7)
}
 0x128   : > { %s868_s5 = scalar_lea.hbm %s1062_s23, 128  ;;  %s872_s8 = scalar_lea.hbm %s1109_s4, 256 }
 0x129   : > { %p869_p8 = scmp.ne.s32.totalorder %s1062_s23, %s868_s5  ;;  %p873_p1 = scmp.lt.u32.totalorder %s1062_s23, %s1109_s4 }
 0x12a   : > { %p874_p0 = scmp.lt.u32.totalorder %s872_s8, %s868_s5  ;;  %p876_p6 = scmp.lt.u32.totalorder %s868_s5, %s1062_s23 }
 0x12b   : > { %p870_p11 = pnand %p869_p8, %p1120_p9 }
 0x12c   : > { %p875_p5 = por %p874_p0, %p873_p1 }
 0x12d   : > { %p871_p13 = pneg %p870_p11 }
 0x12e   : > { %p877_p10 = por %p876_p6, %p875_p5 }
 0x130   : > { %p878_p12 = pnand %p877_p10, %p871_p13 }
 0x132   : > { %881 = shalt.err (!%p878_p12)
}
 0x133   : > { %764 = dma.vmem_to_hbm [thread:$0]  (%p1120_p9), %s1064_s14, 128, %s1062_s23, %s574_s19  }
 0x134 PF: > { %p776_p2 = scmp.ge.s32.totalorder %s920_s18, 2  ;;  %s599_s11 = sand.u32 1, %s908_s15  }
 0x135   : > { %p1121_p3 = scmp.ne.s32.totalorder %s1114_s26, 0  ;;  %s600_s12 = scalar_lea.sflag [#allocation4], %s599_s11 }
 0x137   : > { %p771_p4 = pnand %p776_p2, %p1121_p3 }
 0x139   : > { %903 = dma.done.wait (!%p771_p4), %s600_s12, 128  }
 0x13a   : > { %905 = vsyncadd (!%p771_p4), %s600_s12, 4294967168  ;;  %p15_p7 = scmp.ge.s32.totalorder %s978_s21, 4   ;;  %s1122_s15 = smov %s912_s16 }
 0x13b   : > { %s1123_s16 = smov %s916_s17  ;;  %s1124_s17 = smov %s989_s24 }
 0x13c   : > { %s1125_s18 = smov %s978_s21  ;;  %17 = sbr.rel (!%p15_p7) target bundleno = 4 (0x4), region = 83 }
 0x143   :  { %605 = vsyncpa [#allocation3], 1 }
 0x144   :  { %607 = vsyncpa [#allocation3 + $0x1], 1 }
 0x145   :  { %608 = vsyncpa [#allocation4], 1 }
 0x146   :  { %610 = vsyncpa [#allocation4 + $0x1], 1 }

</bundles_post_ra>
